<compile_context>
chip_gen: v6e
topology: v6e:2x2x1
jax: 0.10.0
libtpu: 0.0.40
codegen_flags: <defaults>
</compile_context>

<pallas_src>
import functools

import jax
import jax.numpy as jnp
from jax.experimental import pallas as pl
from jax.experimental.pallas import tpu as pltpu

LANE = 128   # vreg lane width -> lane-dense feature dims
ROW_ALIGN = 16  # bf16 sublane packing -> (16, 128) minimum LHS tile


def _round_up(x: int, m: int) -> int:
    return (x + m - 1) // m * m


def _cdiv(a: int, b: int) -> int:
    return (a + b - 1) // b


def _hw_config():
    """Per-generation tiling / VMEM budgets (review items: v7x 64 MiB VMEM,
    2 TCs per chip on v7x/v4/v5p; bigger tiles + limits on v5e/v6e)."""
    try:
        kind = jax.devices()[0].device_kind.lower()
    except Exception:  # pragma: no cover - CPU/interpret fallback
        kind = ""
    is_v7 = "v7" in kind
    two_cores = is_v7 or "v4" in kind or ("v5" in kind and "lite" not in kind
                                          and "v5e" not in kind)
    num_cores = 2 if two_cores else 1
    if is_v7:
        # v7x: 64 MiB physical VMEM per TensorCore -> stay conservative.
        return num_cores, 256, 48 * 1024 * 1024, 40 * 1024 * 1024
    # v5e / v6e (and v4/v5p): 128 MiB physical VMEM -> bigger tiles are free.
    return num_cores, 512, 96 * 1024 * 1024, 80 * 1024 * 1024


_NUM_CORES, _TM_MAX, _VMEM_LIMIT_BYTES, _RESIDENT_BUDGET_BYTES = _hw_config()


def _choose_tm(batch: int, tm_max: int, num_cores: int) -> int:
    """Batch row tile: multiple of 16, minimal padded rows, >= num_cores tiles
    (so the "parallel" grid axis actually feeds both TCs on 2-core parts)."""
    rows = _round_up(max(batch, 1), ROW_ALIGN)
    n_tiles = _cdiv(rows, tm_max)
    if num_cores > 1:
        n_tiles = min(_round_up(max(n_tiles, num_cores), num_cores),
                      rows // ROW_ALIGN)
        n_tiles = max(n_tiles, 1)
    return _round_up(_cdiv(rows, n_tiles), ROW_ALIGN)


# --------------------------------------------------------------------------
# Kernels
# --------------------------------------------------------------------------
def _mlp_fused_kernel(x_ref, *refs, num_layers: int):
    """Whole MLP in one kernel body.

    refs = (w0, b0, w1, b1, ..., w_{L-1}, b_{L-1}, out_ref)
    x/w: bf16 (lane-dense padded); b: f32 [1, dout_p]; acc in f32.
    Activations stay in vregs/VMEM between layers (no HBM round-trip).
    """
    out_ref = refs[-1]
    h = x_ref[...]                                  # bf16 [TM, din_p]
    for i in range(num_layers):
        w = refs[2 * i][...]                        # bf16 [din_p, dout_p]
        b = refs[2 * i + 1][...]                    # f32  [1, dout_p]
        y = jnp.dot(h, w, preferred_element_type=jnp.float32) + b
        if i != num_layers - 1:
            # hidden_act = ReLU; keep live activation bytes halved in bf16
            # (next matmul consumes bf16 anyway -> numerically identical).
            h = jnp.maximum(y, 0.0).astype(jnp.bfloat16)
        else:
            h = y                                   # out_act = Identity (f32)
    out_ref[...] = h.astype(out_ref.dtype)


def _linear_kernel(x_ref, w_ref, b_ref, o_ref, *, relu: bool):
    """Single Linear(+ReLU) layer; used by the weight-streaming fallback."""
    y = jnp.dot(x_ref[...], w_ref[...], preferred_element_type=jnp.float32)
    y = y + b_ref[...]
    if relu:
        y = jnp.maximum(y, 0.0)
    o_ref[...] = y.astype(o_ref.dtype)


# --------------------------------------------------------------------------
# Parameter prep
# --------------------------------------------------------------------------
def init_mlp_params(key, input_dim, output_dim, num_neurons):
    """Deterministic params matching nn.Linear shapes (PyTorch-style uniform
    init). Stored as W:[in_dim, out_dim] (transpose of torch), b:[1, out_dim]."""
    input_dims = [input_dim] + list(num_neurons)
    output_dims = list(num_neurons) + [output_dim]
    params = []
    for in_dim, out_dim in zip(input_dims, output_dims):
        key, kw, kb = jax.random.split(key, 3)
        bound = 1.0 / jnp.sqrt(jnp.float32(in_dim))
        w = jax.random.uniform(kw, (in_dim, out_dim), jnp.float32, -bound, bound)
        b = jax.random.uniform(kb, (1, out_dim), jnp.float32, -bound, bound)
        params.append((w, b))
    return params


def prepare_mlp_params(params):
    """One-time pack: zero-pad feature dims to multiples of 128 (exactly 128 —
    wider padding is pure waste for these dims) and cast weights to bf16
    (MXU-native). Biases stay f32 (epilogue math is f32)."""
    packed = []
    for w, b in params:
        din, dout = w.shape
        din_p, dout_p = _round_up(din, LANE), _round_up(dout, LANE)
        w_p = jnp.zeros((din_p, dout_p), jnp.bfloat16).at[:din, :dout].set(
            w.astype(jnp.bfloat16))
        b_p = jnp.zeros((1, dout_p), jnp.float32).at[:, :dout].set(
            b.astype(jnp.float32))
        packed.append((w_p, b_p))
    return packed


# --------------------------------------------------------------------------
# Forward paths
# --------------------------------------------------------------------------
@functools.partial(jax.jit, static_argnums=(2, 3, 4))
def _mlp_forward_fused(x, packed_params, out_dim, tm, single_buffer):
    B, Din = x.shape
    num_layers = len(packed_params)
    din_p = packed_params[0][0].shape[0]
    dout_p = packed_params[-1][0].shape[1]
    B_p = _cdiv(B, tm) * tm

    # Lane-dense, zero-padded bf16 input slab (half the HBM->VMEM bytes of f32;
    # padding contributes exactly 0 through every layer).
    x_p = jnp.zeros((B_p, din_p), jnp.bfloat16).at[:B, :Din].set(
        x.astype(jnp.bfloat16))

    # Constant-index operands: single buffering avoids wasted VMEM copies.
    wkw = dict(pipeline_mode=pl.Buffered(1)) if single_buffer else {}

    flat_wb = []
    in_specs = [pl.BlockSpec((tm, din_p), lambda i: (i, 0))]
    flops = 0
    bytes_accessed = x_p.size * 2 + B_p * dout_p * 4
    for w_p, b_p in packed_params:
        flat_wb += [w_p, b_p]
        in_specs.append(pl.BlockSpec(w_p.shape, lambda i: (0, 0), **wkw))
        in_specs.append(pl.BlockSpec(b_p.shape, lambda i: (0, 0), **wkw))
        flops += 2 * B_p * w_p.shape[0] * w_p.shape[1]
        bytes_accessed += w_p.size * 2 + b_p.size * 4

    kernel = functools.partial(_mlp_fused_kernel, num_layers=num_layers)
    out_p = pl.pallas_call(
        kernel,
        out_shape=jax.ShapeDtypeStruct((B_p, dout_p), jnp.float32),
        grid=(B_p // tm,),
        in_specs=in_specs,
        out_specs=pl.BlockSpec((tm, dout_p), lambda i: (i, 0)),
        compiler_params=pltpu.CompilerParams(
            # Batch axis is embarrassingly parallel -> megacore sharding.
            dimension_semantics=("parallel",),
            vmem_limit_bytes=_VMEM_LIMIT_BYTES,
        ),
        cost_estimate=pl.CostEstimate(
            flops=flops, transcendentals=0, bytes_accessed=bytes_accessed),
    )(x_p, *flat_wb)

    return out_p[:B, :out_dim]


@functools.partial(jax.jit, static_argnums=(2, 3))
def _mlp_forward_layered(x, packed_params, out_dim, tm):
    """Fallback when the all-resident working set exceeds the VMEM budget
    (e.g. wide layers on v7x's 64 MiB): one pallas_call per layer, weights of
    only the active layer resident, activations round-trip HBM in bf16."""
    # TODO(synk): add K-blocked weight streaming for a single layer whose
    # weight alone exceeds the VMEM budget.
    B, Din = x.shape
    num_layers = len(packed_params)
    din_p = packed_params[0][0].shape[0]
    B_p = _cdiv(B, tm) * tm
    h = jnp.zeros((B_p, din_p), jnp.bfloat16).at[:B, :Din].set(
        x.astype(jnp.bfloat16))
    for li, (w_p, b_p) in enumerate(packed_params):
        last = li == num_layers - 1
        dout_p = w_p.shape[1]
        out_dtype = jnp.float32 if last else jnp.bfloat16
        h = pl.pallas_call(
            functools.partial(_linear_kernel, relu=not last),
            out_shape=jax.ShapeDtypeStruct((B_p, dout_p), out_dtype),
            grid=(B_p // tm,),
            in_specs=[pl.BlockSpec((tm, w_p.shape[0]), lambda i: (i, 0)),
                      pl.BlockSpec(w_p.shape, lambda i: (0, 0)),
                      pl.BlockSpec(b_p.shape, lambda i: (0, 0))],
            out_specs=pl.BlockSpec((tm, dout_p), lambda i: (i, 0)),
            compiler_params=pltpu.CompilerParams(
                dimension_semantics=("parallel",),
                vmem_limit_bytes=_VMEM_LIMIT_BYTES),
        )(h, w_p, b_p)
    return h[:B, :out_dim]


def mlp_forward(x, packed_params, out_dim):
    """x: [B, Din] f32, packed_params from prepare_mlp_params -> [B, out_dim] f32."""
    B = x.shape[0]
    tm = _choose_tm(B, _TM_MAX, _NUM_CORES)

    din_p = packed_params[0][0].shape[0]
    dout_p = packed_params[-1][0].shape[1]
    widest = max(max(w.shape) for w, _ in packed_params)
    resident = sum(w.size * w.dtype.itemsize + b.size * b.dtype.itemsize
                   for w, b in packed_params)
    # resident weights + double-buffered x/out tiles + live activation tiles
    working = (resident
               + 2 * (tm * din_p * 2 + tm * dout_p * 4)
               + 2 * tm * widest * 4)

    if working <= _RESIDENT_BUDGET_BYTES:
        try:
            return _mlp_forward_fused(x, packed_params, out_dim, tm, True)
        except Exception:
            # pipeline_mode=pl.Buffered(1) unsupported on this build -> default buffering.
            return _mlp_forward_fused(x, packed_params, out_dim, tm, False)
    return _mlp_forward_layered(x, packed_params, out_dim, tm)


if __name__ == "__main__":
    key = jax.random.PRNGKey(0)
    key, kx, kp = jax.random.split(key, 3)

    # MLP(input_dim=16, output_dim=4, num_neurons=[64, 32], ReLU hidden, Identity out)
    batch, input_dim, output_dim = 8, 16, 4
    num_neurons = [64, 32]

    x = jax.random.normal(kx, (batch, input_dim), dtype=jnp.float32)
    params = init_mlp_params(kp, input_dim, output_dim, num_neurons)
    packed = prepare_mlp_params(params)

    out = mlp_forward(x, packed, output_dim)
    out = jax.block_until_ready(out)
    assert out.shape == (batch, output_dim)

    # Reference 1: same math as the kernel (bf16 MXU inputs, f32 accumulate).
    ref = x
    for i, (w, b) in enumerate(params):
        ref = jnp.dot(ref.astype(jnp.bfloat16), w.astype(jnp.bfloat16),
                      preferred_element_type=jnp.float32) + b
        if i != len(params) - 1:
            ref = jnp.maximum(ref, 0.0)
    assert jnp.allclose(out, ref, atol=1e-4, rtol=1e-4), "mismatch vs bf16 reference"

    # Reference 2: pure-f32 module semantics (only bf16 rounding separates them).
    ref32 = x
    for i, (w, b) in enumerate(params):
        ref32 = ref32 @ w + b
        if i != len(params) - 1:
            ref32 = jnp.maximum(ref32, 0.0)
    assert jnp.allclose(out, ref32, atol=5e-2, rtol=5e-2), "mismatch vs f32 reference"

    # Also exercise the weight-streaming fallback path (used when resident
    # weights would exceed the per-generation VMEM budget, e.g. on v7x).
    out_layered = _mlp_forward_layered(
        x, packed, output_dim, _choose_tm(batch, _TM_MAX, _NUM_CORES))
    out_layered = jax.block_until_ready(out_layered)
    assert jnp.allclose(out_layered, ref, atol=1e-4, rtol=1e-4), "layered path mismatch"

    print("KERNEL_OK")
</pallas_src>

<mosaic_0001>
module attributes {stable_mosaic.version = 11 : i64} {
  func.func @_mlp_fused_kernel(%arg0: i32, %arg1: memref<16x128xbf16, #tpu.memory_space<vmem>>, %arg2: memref<128x128xbf16, #tpu.memory_space<vmem>>, %arg3: memref<1x128xf32, #tpu.memory_space<vmem>>, %arg4: memref<128x128xbf16, #tpu.memory_space<vmem>>, %arg5: memref<1x128xf32, #tpu.memory_space<vmem>>, %arg6: memref<128x128xbf16, #tpu.memory_space<vmem>>, %arg7: memref<1x128xf32, #tpu.memory_space<vmem>>, %arg8: memref<16x128xf32, #tpu.memory_space<vmem>>) attributes {dimension_semantics = [#tpu.dimension_semantics<parallel>], iteration_bounds = array<i64: 1>, scalar_prefetch = 0 : i64, scratch_operands = 0 : i64, tpu.core_type = #tpu.core_type<tc>, window_params = [{transform_indices = @transform_0, window_bounds = array<i64: 16, 128>}, {pipeline_mode = #tpu.pipeline_mode<synchronous>, transform_indices = @transform_1, window_bounds = array<i64: 128, 128>}, {pipeline_mode = #tpu.pipeline_mode<synchronous>, transform_indices = @transform_2, window_bounds = array<i64: 1, 128>}, {pipeline_mode = #tpu.pipeline_mode<synchronous>, transform_indices = @transform_3, window_bounds = array<i64: 128, 128>}, {pipeline_mode = #tpu.pipeline_mode<synchronous>, transform_indices = @transform_4, window_bounds = array<i64: 1, 128>}, {pipeline_mode = #tpu.pipeline_mode<synchronous>, transform_indices = @transform_5, window_bounds = array<i64: 128, 128>}, {pipeline_mode = #tpu.pipeline_mode<synchronous>, transform_indices = @transform_6, window_bounds = array<i64: 1, 128>}, {transform_indices = @transform_7, window_bounds = array<i64: 16, 128>}]} {
    %c0 = arith.constant 0 : index
    %c0_0 = arith.constant 0 : index
    %0 = vector.load %arg1[%c0, %c0_0] : memref<16x128xbf16, #tpu.memory_space<vmem>>, vector<16x128xbf16>
    %c0_1 = arith.constant 0 : index
    %c0_2 = arith.constant 0 : index
    %1 = vector.load %arg2[%c0_1, %c0_2] : memref<128x128xbf16, #tpu.memory_space<vmem>>, vector<128x128xbf16>
    %c0_3 = arith.constant 0 : index
    %c0_4 = arith.constant 0 : index
    %2 = vector.load %arg3[%c0_3, %c0_4] : memref<1x128xf32, #tpu.memory_space<vmem>>, vector<1x128xf32>
    %cst = arith.constant dense<0.000000e+00> : vector<16x128xf32>
    %3 = tpu.matmul %0, %1, %cst {dimension_numbers = #tpu.dot_dimension_numbers<[1], [0], [0], [1], [0, 0, 1, 1], [], []>} : vector<16x128xbf16>, vector<128x128xbf16>, vector<16x128xf32> -> vector<16x128xf32>
    %4 = vector.broadcast %2 : vector<1x128xf32> to vector<16x128xf32>
    %5 = arith.addf %3, %4 : vector<16x128xf32>
    %cst_5 = arith.constant 0.000000e+00 : f32
    %6 = vector.broadcast %cst_5 : f32 to vector<16x128xf32>
    %7 = arith.maximumf %5, %6 : vector<16x128xf32>
    %8 = arith.truncf %7 : vector<16x128xf32> to vector<16x128xbf16>
    %c0_6 = arith.constant 0 : index
    %c0_7 = arith.constant 0 : index
    %9 = vector.load %arg4[%c0_6, %c0_7] : memref<128x128xbf16, #tpu.memory_space<vmem>>, vector<128x128xbf16>
    %c0_8 = arith.constant 0 : index
    %c0_9 = arith.constant 0 : index
    %10 = vector.load %arg5[%c0_8, %c0_9] : memref<1x128xf32, #tpu.memory_space<vmem>>, vector<1x128xf32>
    %cst_10 = arith.constant dense<0.000000e+00> : vector<16x128xf32>
    %11 = tpu.matmul %8, %9, %cst_10 {dimension_numbers = #tpu.dot_dimension_numbers<[1], [0], [0], [1], [0, 0, 1, 1], [], []>} : vector<16x128xbf16>, vector<128x128xbf16>, vector<16x128xf32> -> vector<16x128xf32>
    %12 = vector.broadcast %10 : vector<1x128xf32> to vector<16x128xf32>
    %13 = arith.addf %11, %12 : vector<16x128xf32>
    %cst_11 = arith.constant 0.000000e+00 : f32
    %14 = vector.broadcast %cst_11 : f32 to vector<16x128xf32>
    %15 = arith.maximumf %13, %14 : vector<16x128xf32>
    %16 = arith.truncf %15 : vector<16x128xf32> to vector<16x128xbf16>
    %c0_12 = arith.constant 0 : index
    %c0_13 = arith.constant 0 : index
    %17 = vector.load %arg6[%c0_12, %c0_13] : memref<128x128xbf16, #tpu.memory_space<vmem>>, vector<128x128xbf16>
    %c0_14 = arith.constant 0 : index
    %c0_15 = arith.constant 0 : index
    %18 = vector.load %arg7[%c0_14, %c0_15] : memref<1x128xf32, #tpu.memory_space<vmem>>, vector<1x128xf32>
    %cst_16 = arith.constant dense<0.000000e+00> : vector<16x128xf32>
    %19 = tpu.matmul %16, %17, %cst_16 {dimension_numbers = #tpu.dot_dimension_numbers<[1], [0], [0], [1], [0, 0, 1, 1], [], []>} : vector<16x128xbf16>, vector<128x128xbf16>, vector<16x128xf32> -> vector<16x128xf32>
    %20 = vector.broadcast %18 : vector<1x128xf32> to vector<16x128xf32>
    %21 = arith.addf %19, %20 : vector<16x128xf32>
    %c0_17 = arith.constant 0 : index
    %c0_18 = arith.constant 0 : index
    %22 = vector.load %arg8[%c0_17, %c0_18] : memref<16x128xf32, #tpu.memory_space<vmem>>, vector<16x128xf32>
    tpu.vector_store %arg8[%c0_17, %c0_18], %21 {strides = array<i32>} : memref<16x128xf32, #tpu.memory_space<vmem>>, vector<16x128xf32>,
    return
  }
  func.func @transform_0(%arg0: i32) -> (i32, i32) {
    %c0_i32 = arith.constant 0 : i32
    %c0_i32_0 = arith.constant 0 : i32
    return %arg0, %c0_i32 : i32, i32
  }
  func.func @transform_1(%arg0: i32) -> (i32, i32) {
    %c0_i32 = arith.constant 0 : i32
    %c0_i32_0 = arith.constant 0 : i32
    %c0_i32_1 = arith.constant 0 : i32
    return %c0_i32, %c0_i32_0 : i32, i32
  }
  func.func @transform_2(%arg0: i32) -> (i32, i32) {
    %c0_i32 = arith.constant 0 : i32
    %c0_i32_0 = arith.constant 0 : i32
    %c0_i32_1 = arith.constant 0 : i32
    return %c0_i32, %c0_i32_0 : i32, i32
  }
  func.func @transform_3(%arg0: i32) -> (i32, i32) {
    %c0_i32 = arith.constant 0 : i32
    %c0_i32_0 = arith.constant 0 : i32
    %c0_i32_1 = arith.constant 0 : i32
    return %c0_i32, %c0_i32_0 : i32, i32
  }
  func.func @transform_4(%arg0: i32) -> (i32, i32) {
    %c0_i32 = arith.constant 0 : i32
    %c0_i32_0 = arith.constant 0 : i32
    %c0_i32_1 = arith.constant 0 : i32
    return %c0_i32, %c0_i32_0 : i32, i32
  }
  func.func @transform_5(%arg0: i32) -> (i32, i32) {
    %c0_i32 = arith.constant 0 : i32
    %c0_i32_0 = arith.constant 0 : i32
    %c0_i32_1 = arith.constant 0 : i32
    return %c0_i32, %c0_i32_0 : i32, i32
  }
  func.func @transform_6(%arg0: i32) -> (i32, i32) {
    %c0_i32 = arith.constant 0 : i32
    %c0_i32_0 = arith.constant 0 : i32
    %c0_i32_1 = arith.constant 0 : i32
    return %c0_i32, %c0_i32_0 : i32, i32
  }
  func.func @transform_7(%arg0: i32) -> (i32, i32) {
    %c0_i32 = arith.constant 0 : i32
    %c0_i32_0 = arith.constant 0 : i32
    return %arg0, %c0_i32 : i32, i32
  }
}

module attributes {stable_mosaic.version = 11 : i64} {
  func.func @_mlp_fused_kernel(%arg0: i32, %arg1: memref<16x128xbf16, #tpu.memory_space<vmem>>, %arg2: memref<128x128xbf16, #tpu.memory_space<vmem>>, %arg3: memref<1x128xf32, #tpu.memory_space<vmem>>, %arg4: memref<128x128xbf16, #tpu.memory_space<vmem>>, %arg5: memref<1x128xf32, #tpu.memory_space<vmem>>, %arg6: memref<128x128xbf16, #tpu.memory_space<vmem>>, %arg7: memref<1x128xf32, #tpu.memory_space<vmem>>, %arg8: memref<16x128xf32, #tpu.memory_space<vmem>>) attributes {dimension_semantics = [#tpu.dimension_semantics<parallel>], iteration_bounds = array<i64: 1>, scalar_prefetch = 0 : i64, scratch_operands = 0 : i64, tpu.core_type = #tpu.core_type<tc>, window_params = [{transform_indices = @transform_0, window_bounds = array<i64: 16, 128>}, {pipeline_mode = #tpu.pipeline_mode<synchronous>, transform_indices = @transform_1, window_bounds = array<i64: 128, 128>}, {pipeline_mode = #tpu.pipeline_mode<synchronous>, transform_indices = @transform_2, window_bounds = array<i64: 1, 128>}, {pipeline_mode = #tpu.pipeline_mode<synchronous>, transform_indices = @transform_3, window_bounds = array<i64: 128, 128>}, {pipeline_mode = #tpu.pipeline_mode<synchronous>, transform_indices = @transform_4, window_bounds = array<i64: 1, 128>}, {pipeline_mode = #tpu.pipeline_mode<synchronous>, transform_indices = @transform_5, window_bounds = array<i64: 128, 128>}, {pipeline_mode = #tpu.pipeline_mode<synchronous>, transform_indices = @transform_6, window_bounds = array<i64: 1, 128>}, {transform_indices = @transform_7, window_bounds = array<i64: 16, 128>}]} {
    %c0 = arith.constant 0 : index
    %c0_0 = arith.constant 0 : index
    %0 = vector.load %arg1[%c0, %c0_0] : memref<16x128xbf16, #tpu.memory_space<vmem>>, vector<16x128xbf16>
    %c0_1 = arith.constant 0 : index
    %c0_2 = arith.constant 0 : index
    %1 = vector.load %arg2[%c0_1, %c0_2] : memref<128x128xbf16, #tpu.memory_space<vmem>>, vector<128x128xbf16>
    %c0_3 = arith.constant 0 : index
    %c0_4 = arith.constant 0 : index
    %2 = vector.load %arg3[%c0_3, %c0_4] : memref<1x128xf32, #tpu.memory_space<vmem>>, vector<1x128xf32>
    %cst = arith.constant dense<0.000000e+00> : vector<16x128xf32>
    %3 = tpu.matmul %0, %1, %cst {dimension_numbers = #tpu.dot_dimension_numbers<[1], [0], [0], [1], [0, 0, 1, 1], [], []>} : vector<16x128xbf16>, vector<128x128xbf16>, vector<16x128xf32> -> vector<16x128xf32>
    %4 = vector.broadcast %2 : vector<1x128xf32> to vector<16x128xf32>
    %5 = arith.addf %3, %4 : vector<16x128xf32>
    %cst_5 = arith.constant 0.000000e+00 : f32
    %6 = vector.broadcast %cst_5 : f32 to vector<16x128xf32>
    %7 = arith.maximumf %5, %6 : vector<16x128xf32>
    %8 = arith.truncf %7 : vector<16x128xf32> to vector<16x128xbf16>
    %c0_6 = arith.constant 0 : index
    %c0_7 = arith.constant 0 : index
    %9 = vector.load %arg4[%c0_6, %c0_7] : memref<128x128xbf16, #tpu.memory_space<vmem>>, vector<128x128xbf16>
    %c0_8 = arith.constant 0 : index
    %c0_9 = arith.constant 0 : index
    %10 = vector.load %arg5[%c0_8, %c0_9] : memref<1x128xf32, #tpu.memory_space<vmem>>, vector<1x128xf32>
    %cst_10 = arith.constant dense<0.000000e+00> : vector<16x128xf32>
    %11 = tpu.matmul %8, %9, %cst_10 {dimension_numbers = #tpu.dot_dimension_numbers<[1], [0], [0], [1], [0, 0, 1, 1], [], []>} : vector<16x128xbf16>, vector<128x128xbf16>, vector<16x128xf32> -> vector<16x128xf32>
    %12 = vector.broadcast %10 : vector<1x128xf32> to vector<16x128xf32>
    %13 = arith.addf %11, %12 : vector<16x128xf32>
    %cst_11 = arith.constant 0.000000e+00 : f32
    %14 = vector.broadcast %cst_11 : f32 to vector<16x128xf32>
    %15 = arith.maximumf %13, %14 : vector<16x128xf32>
    %16 = arith.truncf %15 : vector<16x128xf32> to vector<16x128xbf16>
    %c0_12 = arith.constant 0 : index
    %c0_13 = arith.constant 0 : index
    %17 = vector.load %arg6[%c0_12, %c0_13] : memref<128x128xbf16, #tpu.memory_space<vmem>>, vector<128x128xbf16>
    %c0_14 = arith.constant 0 : index
    %c0_15 = arith.constant 0 : index
    %18 = vector.load %arg7[%c0_14, %c0_15] : memref<1x128xf32, #tpu.memory_space<vmem>>, vector<1x128xf32>
    %cst_16 = arith.constant dense<0.000000e+00> : vector<16x128xf32>
    %19 = tpu.matmul %16, %17, %cst_16 {dimension_numbers = #tpu.dot_dimension_numbers<[1], [0], [0], [1], [0, 0, 1, 1], [], []>} : vector<16x128xbf16>, vector<128x128xbf16>, vector<16x128xf32> -> vector<16x128xf32>
    %20 = vector.broadcast %18 : vector<1x128xf32> to vector<16x128xf32>
    %21 = arith.addf %19, %20 : vector<16x128xf32>
    %c0_17 = arith.constant 0 : index
    %c0_18 = arith.constant 0 : index
    %22 = vector.load %arg8[%c0_17, %c0_18] : memref<16x128xf32, #tpu.memory_space<vmem>>, vector<16x128xf32>
    tpu.vector_store %arg8[%c0_17, %c0_18], %21 {strides = array<i32>} : memref<16x128xf32, #tpu.memory_space<vmem>>, vector<16x128xf32>,
    return
  }
  func.func @transform_0(%arg0: i32) -> (i32, i32) {
    %c0_i32 = arith.constant 0 : i32
    %c0_i32_0 = arith.constant 0 : i32
    return %arg0, %c0_i32 : i32, i32
  }
  func.func @transform_1(%arg0: i32) -> (i32, i32) {
    %c0_i32 = arith.constant 0 : i32
    %c0_i32_0 = arith.constant 0 : i32
    %c0_i32_1 = arith.constant 0 : i32
    return %c0_i32, %c0_i32_0 : i32, i32
  }
  func.func @transform_2(%arg0: i32) -> (i32, i32) {
    %c0_i32 = arith.constant 0 : i32
    %c0_i32_0 = arith.constant 0 : i32
    %c0_i32_1 = arith.constant 0 : i32
    return %c0_i32, %c0_i32_0 : i32, i32
  }
  func.func @transform_3(%arg0: i32) -> (i32, i32) {
    %c0_i32 = arith.constant 0 : i32
    %c0_i32_0 = arith.constant 0 : i32
    %c0_i32_1 = arith.constant 0 : i32
    return %c0_i32, %c0_i32_0 : i32, i32
  }
  func.func @transform_4(%arg0: i32) -> (i32, i32) {
    %c0_i32 = arith.constant 0 : i32
    %c0_i32_0 = arith.constant 0 : i32
    %c0_i32_1 = arith.constant 0 : i32
    return %c0_i32, %c0_i32_0 : i32, i32
  }
  func.func @transform_5(%arg0: i32) -> (i32, i32) {
    %c0_i32 = arith.constant 0 : i32
    %c0_i32_0 = arith.constant 0 : i32
    %c0_i32_1 = arith.constant 0 : i32
    return %c0_i32, %c0_i32_0 : i32, i32
  }
  func.func @transform_6(%arg0: i32) -> (i32, i32) {
    %c0_i32 = arith.constant 0 : i32
    %c0_i32_0 = arith.constant 0 : i32
    %c0_i32_1 = arith.constant 0 : i32
    return %c0_i32, %c0_i32_0 : i32, i32
  }
  func.func @transform_7(%arg0: i32) -> (i32, i32) {
    %c0_i32 = arith.constant 0 : i32
    %c0_i32_0 = arith.constant 0 : i32
    return %arg0, %c0_i32 : i32, i32
  }
}

</mosaic_0001>

<bundles_post_ra>
// kernel: _mlp_forward_fused.1
= control target key start
LH: loop header
LB: loop body
LE: loop exit
PB: predicated region body
PF: predicated region fallthrough
CT: control target
= control target key end

     0   :  { %12 = vsyncpa [#allocation3], 0  ;;  %s741_s0 = inlined_call_operand.vmem [shape: bf16[16,128], index: 0, kind: input, shape index: {}]   ;;  %s742_s1 = inlined_call_operand.hbm [shape: bf16[128,128], index: 1, kind: input, shape index: {}]   ;;  %s743_s2 = inlined_call_operand.vmem [shape: f32[1,128], index: 2, kind: input, shape index: {}]   ;;  %s744_s3 = inlined_call_operand.hbm [shape: bf16[128,128], index: 3, kind: input, shape index: {}]   ;;  %s745_s4 = inlined_call_operand.vmem [shape: f32[1,128], index: 4, kind: input, shape index: {}]   ;;  %s746_s5 = inlined_call_operand.hbm [shape: bf16[128,128], index: 5, kind: input, shape index: {}]   ;;  %s747_s6 = inlined_call_operand.vmem [shape: f32[1,128], index: 6, kind: input, shape index: {}]   ;;  %s748_s7 = inlined_call_operand.vmem [shape: f32[16,128], index: 7, kind: output, shape index: {}]  }
   0x1   :  { %13 = vsyncpa [#allocation5], 0  ;;  %s637_s24 = smov [#allocation4]   ;;  %s638_s26 = smov [#allocation2]  }
   0x2   :  { %s35_s25 = sshll.u32 %s637_s24, 4  ;;  %s21_s27 = sshll.u32 %s638_s26, 4  ;;  %s36_s25 = int_to_ptr.vmem [resolvable:$true] %s35_s25  ;;  %s22_s27 = int_to_ptr.vmem [resolvable:$true] %s21_s27 }
   0x3   :  { %s581_s28 = scalar_lea.vmem %s36_s25, 1024  ;;  %p586_p1 = scmp.lt.s32.totalorder %s36_s25, %s36_s25 }
   0x4   :  { %p582_p0 = scmp.ne.s32.totalorder %s36_s25, %s581_s28  ;;  %p587_p2 = scmp.lt.s32.totalorder %s581_s28, %s581_s28 }
   0x6   :  { %p588_p3 = por %p587_p2, %p586_p1 }
   0x8   :  { %p589_p4 = pnand %p588_p3, %p582_p0 }
   0xa   :  { %592 = shalt.err (!%p589_p4)
}
   0xb   :  { %s639_s29 = smov 64   ;;  %s640_s30 = smov 4  }
   0xc   :  { %41 = dma.hbm_to_vmem [thread:$0]  %s744_s3, 1024, %s36_s25, [#allocation5], %s639_s29, %s639_s29, %s640_s30  }
   0xd   :  { %s601_s10 = scalar_lea.vmem %s22_s27, 1024  ;;  %p606_p6 = scmp.lt.s32.totalorder %s22_s27, %s22_s27 }
   0xe   :  { %p602_p5 = scmp.ne.s32.totalorder %s22_s27, %s601_s10  ;;  %p607_p7 = scmp.lt.s32.totalorder %s601_s10, %s601_s10 }
  0x10   :  { %p608_p8 = por %p607_p7, %p606_p6 }
  0x12   :  { %p609_p9 = pnand %p608_p8, %p602_p5 }
  0x14   :  { %612 = shalt.err (!%p609_p9)
}
  0x15   :  { %27 = dma.hbm_to_vmem [thread:$0]  %s742_s1, 1024, %s22_s27, [#allocation3], %s639_s29, %s639_s29, %s640_s30  }
  0x16   :  { %s641_s13 = smov [#allocation6]  }
  0x17   :  { %s49_s14 = sshll.u32 %s641_s13, 4  ;;  %s50_s14 = int_to_ptr.vmem [resolvable:$true] %s49_s14 }
  0x18   :  { %s621_s15 = scalar_lea.vmem %s50_s14, 1024  ;;  %p626_p11 = scmp.lt.s32.totalorder %s50_s14, %s50_s14 }
  0x19   :  { %p622_p10 = scmp.ne.s32.totalorder %s50_s14, %s621_s15  ;;  %p627_p12 = scmp.lt.s32.totalorder %s621_s15, %s621_s15 }
  0x1b   :  { %p628_p13 = por %p627_p12, %p626_p11 }
  0x1d   :  { %p629_p0 = pnand %p628_p13, %p622_p10 }
  0x1f   :  { %632 = shalt.err (!%p629_p0)
}
  0x20   :  { %55 = dma.hbm_to_vmem [thread:$0]  %s746_s5, 1024, %s50_s14, [#allocation5], %s639_s29, %s639_s29, %s640_s30  }
  0x21   :  { %633 = dma.done.wait [#allocation3], 1024  }
  0x22   :  { %634 = vsyncadd [#allocation3], 4294966272 }
  0x23   :  { %635 = dma.done.wait [#allocation5], 2048  }
  0x24   :  { %636 = vsyncadd [#allocation5], 4294965248  ;;  %v642_v0 = vmov 0.0   ;;  %vm643_vm0 = vmmov 0   ;;  %v548_v1 = vld [vmem:[#allocation2 + $0x38] sm:$0xff]   ;;  %v549_v2 = vld [vmem:[#allocation2 + $0x30] sm:$0xff]  }
  0x25   :  { %481 = vmatprep.subr.bf16.mxu0 %v642_v0  ;;  %497 = vmatprep.mubr.msk.bf16.mxu0 %vm643_vm0, %v642_v0  ;;  %v550_v3 = vld [vmem:[#allocation2 + $0x28] sm:$0xff]   ;;  %v557_v4 = vld [vmem:[#allocation4 + $0x38] sm:$0xff]   ;;  %v551_v5 = vld [vmem:[#allocation2 + $0x20] sm:$0xff]  }
  0x26   :  { %501 = vmatprep.subr.bf16.mxu1 %v642_v0  ;;  %517 = vmatprep.mubr.msk.bf16.mxu1 %vm643_vm0, %v642_v0  ;;  %v558_v6 = vld [vmem:[#allocation4 + $0x30] sm:$0xff]   ;;  %v552_v7 = vld [vmem:[#allocation2 + $0x18] sm:$0xff]   ;;  %v559_v8 = vld [vmem:[#allocation4 + $0x28] sm:$0xff]  }
  0x27   :  { %482 = vmatpush3.bf16.msra.mxu0 %v548_v1  ;;  %502 = vmatpush3.bf16.msra.mxu1 %v557_v4  ;;  %v553_v9 = vld [vmem:[#allocation2 + $0x10] sm:$0xff]   ;;  %v560_v10 = vld [vmem:[#allocation4 + $0x20] sm:$0xff]   ;;  %v554_v11 = vld [vmem:[#allocation2 + $0x8] sm:$0xff]  }
  0x28   :  { %483 = vmatprep.subr.bf16.mxu0 %v642_v0  ;;  %503 = vmatprep.subr.bf16.mxu1 %v642_v0  ;;  %v561_v12 = vld [vmem:[#allocation4 + $0x18] sm:$0xff]   ;;  %v555_v13 = vld [vmem:[#allocation2] sm:$0xff]   ;;  %v562_v15 = vld [vmem:[#allocation4 + $0x10] sm:$0xff]  }
  0x29   :  { %v556_v14 = vld [vmem:[%s741_s0] sm:$0xff]   ;;  %v563_v16 = vld [vmem:[#allocation4 + $0x8] sm:$0xff]   ;;  %v565_v18 = vld [vmem:[#allocation6 + $0x38] sm:$0xff]  }
  0x2a   :  { %v564_v17 = vld [vmem:[#allocation4] sm:$0xff]   ;;  %v566_v19 = vld [vmem:[#allocation6 + $0x30] sm:$0xff]   ;;  %v567_v20 = vld [vmem:[#allocation6 + $0x28] sm:$0xff]  }
  0x2b   :  { %484 = vmatpush3.bf16.msra.mxu0 %v549_v2  ;;  %504 = vmatpush3.bf16.msra.mxu1 %v558_v6  ;;  %v568_v21 = vld [vmem:[#allocation6 + $0x20] sm:$0xff]   ;;  %v569_v22 = vld [vmem:[#allocation6 + $0x18] sm:$0xff]   ;;  %v570_v33 = vld [vmem:[#allocation6 + $0x10] sm:$0xff]  }
  0x2c   :  { %485 = vmatprep.subr.bf16.mxu0 %v642_v0  ;;  %505 = vmatprep.subr.bf16.mxu1 %v642_v0  ;;  %v426_v23 = vld [vmem:[%s743_s2] ss:$0 sm:$0xff]  ;;  %v571_v34 = vld [vmem:[#allocation6 + $0x8] sm:$0xff]  }
  0x2d   :  { %v572_v35 = vld [vmem:[#allocation6] sm:$0xff]  }
  0x2e   :  { %v436_v36 = vld [vmem:[%s745_s4] ss:$0 sm:$0xff] }
  0x2f   :  { %486 = vmatpush3.bf16.msra.mxu0 %v550_v3  ;;  %506 = vmatpush3.bf16.msra.mxu1 %v559_v8  ;;  %v445_v46 = vld [vmem:[%s747_s6] ss:$0 sm:$0xff] }
  0x30   :  { %487 = vmatprep.subr.bf16.mxu0 %v642_v0  ;;  %507 = vmatprep.subr.bf16.mxu1 %v642_v0 }
  0x33   :  { %488 = vmatpush3.bf16.msra.mxu0 %v551_v5  ;;  %508 = vmatpush3.bf16.msra.mxu1 %v560_v10 }
  0x34   :  { %489 = vmatprep.subr.bf16.mxu0 %v642_v0  ;;  %509 = vmatprep.subr.bf16.mxu1 %v642_v0 }
  0x37   :  { %490 = vmatpush3.bf16.msra.mxu0 %v552_v7  ;;  %510 = vmatpush3.bf16.msra.mxu1 %v561_v12 }
  0x38   :  { %491 = vmatprep.subr.bf16.mxu0 %v642_v0  ;;  %511 = vmatprep.subr.bf16.mxu1 %v642_v0 }
  0x3b   :  { %492 = vmatpush3.bf16.msra.mxu0 %v553_v9  ;;  %512 = vmatpush3.bf16.msra.mxu1 %v562_v15 }
  0x3c   :  { %493 = vmatprep.subr.bf16.mxu0 %v642_v0  ;;  %513 = vmatprep.subr.bf16.mxu1 %v642_v0 }
  0x3f   :  { %494 = vmatpush3.bf16.msra.mxu0 %v554_v11  ;;  %514 = vmatpush3.bf16.msra.mxu1 %v563_v16 }
  0x40   :  { %495 = vmatprep.subr.bf16.mxu0 %v642_v0  ;;  %515 = vmatprep.subr.bf16.mxu1 %v642_v0 }
  0x43   :  { %496 = vmatpush3.bf16.msra.mxu0 %v555_v13  ;;  %516 = vmatpush3.bf16.msra.mxu1 %v564_v17 }
  0x44   :  { %521 = vmatprep.subr.bf16.mxu0 %v642_v0 }
  0x46   :  { %498 = vmatmul.mubr.bf16.vlgmr.msra.gmra.mxu0 %v556_v14 }
  0x47   :  { %537 = vmatprep.mubr.msk.bf16.mxu0 %vm643_vm0, %v642_v0  ;;  %522 = vmatpush3.bf16.msra.mxu0 %v565_v18 }
  0x48   :  { %523 = vmatprep.subr.bf16.mxu0 %v642_v0 }
  0x4b   :  { %524 = vmatpush3.bf16.msra.mxu0 %v566_v19 }
  0x4c   :  { %525 = vmatprep.subr.bf16.mxu0 %v642_v0 }
  0x4f   :  { %526 = vmatpush3.bf16.msra.mxu0 %v567_v20 }
  0x50   :  { %527 = vmatprep.subr.bf16.mxu0 %v642_v0 }
  0x53   :  { %528 = vmatpush3.bf16.msra.mxu0 %v568_v21 }
  0x54   :  { %529 = vmatprep.subr.bf16.mxu0 %v642_v0 }
  0x57   :  { %530 = vmatpush3.bf16.msra.mxu0 %v569_v22 }
  0x58   :  { %531 = vmatprep.subr.bf16.mxu0 %v642_v0 }
  0x5b   :  { %532 = vmatpush3.bf16.msra.mxu0 %v570_v33 }
  0x5c   :  { %533 = vmatprep.subr.bf16.mxu0 %v642_v0 }
  0x5f   :  { %534 = vmatpush3.bf16.msra.mxu0 %v571_v34 }
  0x60   :  { %535 = vmatprep.subr.bf16.mxu0 %v642_v0 }
  0x63   :  { %536 = vmatpush3.bf16.msra.mxu0 %v572_v35 }
 0x106   :  { %v181_v24 = vpop.f32.mrf.mxu0 }
 0x107   :  { %v182_v26 = vadd.f32 %v426_v23, %v181_v24 }
 0x108   :  { %v499_v25 = vpop.f32.mrf.mxu0 }
 0x109   :  { %v188_v30 = vmax.f32 %v182_v26, 0.0 }
 0x10a   :  { %v184_v27 = vpop.f32.mrf.mxu0 }
 0x10b   :  { %v185_v28 = vadd.f32 %v426_v23, %v184_v27 }
 0x10c   :  { %v500_v29 = vpop.f32.mrf.mxu0 }
 0x10d   :  { %v189_v31 = vmax.f32 %v185_v28, 0.0 }
 0x10f   :  { %v190_v32 = vpack.c.bf16 %v189_v31, %v188_v30 }
 0x111   :  { %518 = vmatmul.mubr.bf16.vlgmr.msra.gmra.mxu1 %v190_v32 }
 0x1d1   :  { %v296_v37 = vpop.f32.mrf.mxu1 }
 0x1d2   :  { %v297_v39 = vadd.f32 %v436_v36, %v296_v37 }
 0x1d3   :  { %v519_v38 = vpop.f32.mrf.mxu1 }
 0x1d4   :  { %v303_v43 = vmax.f32 %v297_v39, 0.0 }
 0x1d5   :  { %v299_v40 = vpop.f32.mrf.mxu1 }
 0x1d6   :  { %v300_v41 = vadd.f32 %v436_v36, %v299_v40 }
 0x1d7   :  { %v520_v42 = vpop.f32.mrf.mxu1 }
 0x1d8   :  { %v304_v44 = vmax.f32 %v300_v41, 0.0 }
 0x1da   :  { %v305_v45 = vpack.c.bf16 %v304_v44, %v303_v43 }
 0x1dc   :  { %538 = vmatmul.mubr.bf16.vlgmr.msra.gmra.mxu0 %v305_v45 }
 0x29c   :  { %v411_v47 = vpop.f32.mrf.mxu0 }
 0x29d   :  { %v412_v48 = vadd.f32 %v445_v46, %v411_v47 }
 0x29e   :  { %v539_v49 = vpop.f32.mrf.mxu0 }
 0x29f   :  { %418 = vst [vmem:[%s748_s7] sm:$0xff] %v412_v48 }
 0x2a0   :  { %v414_v50 = vpop.f32.mrf.mxu0 }
 0x2a1   :  { %v415_v51 = vadd.f32 %v445_v46, %v414_v50 }
 0x2a2   :  { %v540_v52 = vpop.f32.mrf.mxu0 }
 0x2a3   :  { %419 = vst [vmem:[%s748_s7 + $0x8] sm:$0xff] %v415_v51 }
 0x2a4   :  { %424 = vsyncpa [#allocation3], 1 }
 0x2a5   :  { %425 = vsyncpa [#allocation5], 1 }

// kernel: _mlp_forward_fused.1
= control target key start
LH: loop header
LB: loop body
LE: loop exit
PB: predicated region body
PF: predicated region fallthrough
CT: control target
= control target key end

     0   :  { %12 = vsyncpa [#allocation3], 0  ;;  %s741_s0 = inlined_call_operand.vmem [shape: bf16[16,128], index: 0, kind: input, shape index: {}]   ;;  %s742_s1 = inlined_call_operand.hbm [shape: bf16[128,128], index: 1, kind: input, shape index: {}]   ;;  %s743_s2 = inlined_call_operand.vmem [shape: f32[1,128], index: 2, kind: input, shape index: {}]   ;;  %s744_s3 = inlined_call_operand.hbm [shape: bf16[128,128], index: 3, kind: input, shape index: {}]   ;;  %s745_s4 = inlined_call_operand.vmem [shape: f32[1,128], index: 4, kind: input, shape index: {}]   ;;  %s746_s5 = inlined_call_operand.hbm [shape: bf16[128,128], index: 5, kind: input, shape index: {}]   ;;  %s747_s6 = inlined_call_operand.vmem [shape: f32[1,128], index: 6, kind: input, shape index: {}]   ;;  %s748_s7 = inlined_call_operand.vmem [shape: f32[16,128], index: 7, kind: output, shape index: {}]  }
   0x1   :  { %13 = vsyncpa [#allocation5], 0  ;;  %s637_s24 = smov [#allocation4]   ;;  %s638_s26 = smov [#allocation2]  }
   0x2   :  { %s35_s25 = sshll.u32 %s637_s24, 4  ;;  %s21_s27 = sshll.u32 %s638_s26, 4  ;;  %s36_s25 = int_to_ptr.vmem [resolvable:$true] %s35_s25  ;;  %s22_s27 = int_to_ptr.vmem [resolvable:$true] %s21_s27 }
   0x3   :  { %s581_s28 = scalar_lea.vmem %s36_s25, 1024  ;;  %p586_p1 = scmp.lt.s32.totalorder %s36_s25, %s36_s25 }
   0x4   :  { %p582_p0 = scmp.ne.s32.totalorder %s36_s25, %s581_s28  ;;  %p587_p2 = scmp.lt.s32.totalorder %s581_s28, %s581_s28 }
   0x6   :  { %p588_p3 = por %p587_p2, %p586_p1 }
   0x8   :  { %p589_p4 = pnand %p588_p3, %p582_p0 }
   0xa   :  { %592 = shalt.err (!%p589_p4)
}
   0xb   :  { %s639_s29 = smov 64   ;;  %s640_s30 = smov 4  }
   0xc   :  { %41 = dma.hbm_to_vmem [thread:$0]  %s744_s3, 1024, %s36_s25, [#allocation5], %s639_s29, %s639_s29, %s640_s30  }
   0xd   :  { %s601_s10 = scalar_lea.vmem %s22_s27, 1024  ;;  %p606_p6 = scmp.lt.s32.totalorder %s22_s27, %s22_s27 }
   0xe   :  { %p602_p5 = scmp.ne.s32.totalorder %s22_s27, %s601_s10  ;;  %p607_p7 = scmp.lt.s32.totalorder %s601_s10, %s601_s10 }
  0x10   :  { %p608_p8 = por %p607_p7, %p606_p6 }
  0x12   :  { %p609_p9 = pnand %p608_p8, %p602_p5 }
  0x14   :  { %612 = shalt.err (!%p609_p9)
}
  0x15   :  { %27 = dma.hbm_to_vmem [thread:$0]  %s742_s1, 1024, %s22_s27, [#allocation3], %s639_s29, %s639_s29, %s640_s30  }
  0x16   :  { %s641_s13 = smov [#allocation6]  }
  0x17   :  { %s49_s14 = sshll.u32 %s641_s13, 4  ;;  %s50_s14 = int_to_ptr.vmem [resolvable:$true] %s49_s14 }
  0x18   :  { %s621_s15 = scalar_lea.vmem %s50_s14, 1024  ;;  %p626_p11 = scmp.lt.s32.totalorder %s50_s14, %s50_s14 }
  0x19   :  { %p622_p10 = scmp.ne.s32.totalorder %s50_s14, %s621_s15  ;;  %p627_p12 = scmp.lt.s32.totalorder %s621_s15, %s621_s15 }
  0x1b   :  { %p628_p13 = por %p627_p12, %p626_p11 }
  0x1d   :  { %p629_p0 = pnand %p628_p13, %p622_p10 }
  0x1f   :  { %632 = shalt.err (!%p629_p0)
}
  0x20   :  { %55 = dma.hbm_to_vmem [thread:$0]  %s746_s5, 1024, %s50_s14, [#allocation5], %s639_s29, %s639_s29, %s640_s30  }
  0x21   :  { %633 = dma.done.wait [#allocation3], 1024  }
  0x22   :  { %634 = vsyncadd [#allocation3], 4294966272 }
  0x23   :  { %635 = dma.done.wait [#allocation5], 2048  }
  0x24   :  { %636 = vsyncadd [#allocation5], 4294965248  ;;  %v642_v0 = vmov 0.0   ;;  %vm643_vm0 = vmmov 0   ;;  %v548_v1 = vld [vmem:[#allocation2 + $0x38] sm:$0xff]   ;;  %v549_v2 = vld [vmem:[#allocation2 + $0x30] sm:$0xff]  }
  0x25   :  { %481 = vmatprep.subr.bf16.mxu0 %v642_v0  ;;  %497 = vmatprep.mubr.msk.bf16.mxu0 %vm643_vm0, %v642_v0  ;;  %v550_v3 = vld [vmem:[#allocation2 + $0x28] sm:$0xff]   ;;  %v557_v4 = vld [vmem:[#allocation4 + $0x38] sm:$0xff]   ;;  %v551_v5 = vld [vmem:[#allocation2 + $0x20] sm:$0xff]  }
  0x26   :  { %501 = vmatprep.subr.bf16.mxu1 %v642_v0  ;;  %517 = vmatprep.mubr.msk.bf16.mxu1 %vm643_vm0, %v642_v0  ;;  %v558_v6 = vld [vmem:[#allocation4 + $0x30] sm:$0xff]   ;;  %v552_v7 = vld [vmem:[#allocation2 + $0x18] sm:$0xff]   ;;  %v559_v8 = vld [vmem:[#allocation4 + $0x28] sm:$0xff]  }
  0x27   :  { %482 = vmatpush3.bf16.msra.mxu0 %v548_v1  ;;  %502 = vmatpush3.bf16.msra.mxu1 %v557_v4  ;;  %v553_v9 = vld [vmem:[#allocation2 + $0x10] sm:$0xff]   ;;  %v560_v10 = vld [vmem:[#allocation4 + $0x20] sm:$0xff]   ;;  %v554_v11 = vld [vmem:[#allocation2 + $0x8] sm:$0xff]  }
  0x28   :  { %483 = vmatprep.subr.bf16.mxu0 %v642_v0  ;;  %503 = vmatprep.subr.bf16.mxu1 %v642_v0  ;;  %v561_v12 = vld [vmem:[#allocation4 + $0x18] sm:$0xff]   ;;  %v555_v13 = vld [vmem:[#allocation2] sm:$0xff]   ;;  %v562_v15 = vld [vmem:[#allocation4 + $0x10] sm:$0xff]  }
  0x29   :  { %v556_v14 = vld [vmem:[%s741_s0] sm:$0xff]   ;;  %v563_v16 = vld [vmem:[#allocation4 + $0x8] sm:$0xff]   ;;  %v565_v18 = vld [vmem:[#allocation6 + $0x38] sm:$0xff]  }
  0x2a   :  { %v564_v17 = vld [vmem:[#allocation4] sm:$0xff]   ;;  %v566_v19 = vld [vmem:[#allocation6 + $0x30] sm:$0xff]   ;;  %v567_v20 = vld [vmem:[#allocation6 + $0x28] sm:$0xff]  }
  0x2b   :  { %484 = vmatpush3.bf16.msra.mxu0 %v549_v2  ;;  %504 = vmatpush3.bf16.msra.mxu1 %v558_v6  ;;  %v568_v21 = vld [vmem:[#allocation6 + $0x20] sm:$0xff]   ;;  %v569_v22 = vld [vmem:[#allocation6 + $0x18] sm:$0xff]   ;;  %v570_v33 = vld [vmem:[#allocation6 + $0x10] sm:$0xff]  }
  0x2c   :  { %485 = vmatprep.subr.bf16.mxu0 %v642_v0  ;;  %505 = vmatprep.subr.bf16.mxu1 %v642_v0  ;;  %v426_v23 = vld [vmem:[%s743_s2] ss:$0 sm:$0xff]  ;;  %v571_v34 = vld [vmem:[#allocation6 + $0x8] sm:$0xff]  }
  0x2d   :  { %v572_v35 = vld [vmem:[#allocation6] sm:$0xff]  }
  0x2e   :  { %v436_v36 = vld [vmem:[%s745_s4] ss:$0 sm:$0xff] }
  0x2f   :  { %486 = vmatpush3.bf16.msra.mxu0 %v550_v3  ;;  %506 = vmatpush3.bf16.msra.mxu1 %v559_v8  ;;  %v445_v46 = vld [vmem:[%s747_s6] ss:$0 sm:$0xff] }
  0x30   :  { %487 = vmatprep.subr.bf16.mxu0 %v642_v0  ;;  %507 = vmatprep.subr.bf16.mxu1 %v642_v0 }
  0x33   :  { %488 = vmatpush3.bf16.msra.mxu0 %v551_v5  ;;  %508 = vmatpush3.bf16.msra.mxu1 %v560_v10 }
  0x34   :  { %489 = vmatprep.subr.bf16.mxu0 %v642_v0  ;;  %509 = vmatprep.subr.bf16.mxu1 %v642_v0 }
  0x37   :  { %490 = vmatpush3.bf16.msra.mxu0 %v552_v7  ;;  %510 = vmatpush3.bf16.msra.mxu1 %v561_v12 }
  0x38   :  { %491 = vmatprep.subr.bf16.mxu0 %v642_v0  ;;  %511 = vmatprep.subr.bf16.mxu1 %v642_v0 }
  0x3b   :  { %492 = vmatpush3.bf16.msra.mxu0 %v553_v9  ;;  %512 = vmatpush3.bf16.msra.mxu1 %v562_v15 }
  0x3c   :  { %493 = vmatprep.subr.bf16.mxu0 %v642_v0  ;;  %513 = vmatprep.subr.bf16.mxu1 %v642_v0 }
  0x3f   :  { %494 = vmatpush3.bf16.msra.mxu0 %v554_v11  ;;  %514 = vmatpush3.bf16.msra.mxu1 %v563_v16 }
  0x40   :  { %495 = vmatprep.subr.bf16.mxu0 %v642_v0  ;;  %515 = vmatprep.subr.bf16.mxu1 %v642_v0 }
  0x43   :  { %496 = vmatpush3.bf16.msra.mxu0 %v555_v13  ;;  %516 = vmatpush3.bf16.msra.mxu1 %v564_v17 }
  0x44   :  { %521 = vmatprep.subr.bf16.mxu0 %v642_v0 }
  0x46   :  { %498 = vmatmul.mubr.bf16.vlgmr.msra.gmra.mxu0 %v556_v14 }
  0x47   :  { %537 = vmatprep.mubr.msk.bf16.mxu0 %vm643_vm0, %v642_v0  ;;  %522 = vmatpush3.bf16.msra.mxu0 %v565_v18 }
  0x48   :  { %523 = vmatprep.subr.bf16.mxu0 %v642_v0 }
  0x4b   :  { %524 = vmatpush3.bf16.msra.mxu0 %v566_v19 }
  0x4c   :  { %525 = vmatprep.subr.bf16.mxu0 %v642_v0 }
  0x4f   :  { %526 = vmatpush3.bf16.msra.mxu0 %v567_v20 }
  0x50   :  { %527 = vmatprep.subr.bf16.mxu0 %v642_v0 }
  0x53   :  { %528 = vmatpush3.bf16.msra.mxu0 %v568_v21 }
  0x54   :  { %529 = vmatprep.subr.bf16.mxu0 %v642_v0 }
  0x57   :  { %530 = vmatpush3.bf16.msra.mxu0 %v569_v22 }
  0x58   :  { %531 = vmatprep.subr.bf16.mxu0 %v642_v0 }
  0x5b   :  { %532 = vmatpush3.bf16.msra.mxu0 %v570_v33 }
  0x5c   :  { %533 = vmatprep.subr.bf16.mxu0 %v642_v0 }
  0x5f   :  { %534 = vmatpush3.bf16.msra.mxu0 %v571_v34 }
  0x60   :  { %535 = vmatprep.subr.bf16.mxu0 %v642_v0 }
  0x63   :  { %536 = vmatpush3.bf16.msra.mxu0 %v572_v35 }
 0x106   :  { %v181_v24 = vpop.f32.mrf.mxu0 }
 0x107   :  { %v182_v26 = vadd.f32 %v426_v23, %v181_v24 }
 0x108   :  { %v499_v25 = vpop.f32.mrf.mxu0 }
 0x109   :  { %v188_v30 = vmax.f32 %v182_v26, 0.0 }
 0x10a   :  { %v184_v27 = vpop.f32.mrf.mxu0 }
 0x10b   :  { %v185_v28 = vadd.f32 %v426_v23, %v184_v27 }
 0x10c   :  { %v500_v29 = vpop.f32.mrf.mxu0 }
 0x10d   :  { %v189_v31 = vmax.f32 %v185_v28, 0.0 }
 0x10f   :  { %v190_v32 = vpack.c.bf16 %v189_v31, %v188_v30 }
 0x111   :  { %518 = vmatmul.mubr.bf16.vlgmr.msra.gmra.mxu1 %v190_v32 }
 0x1d1   :  { %v296_v37 = vpop.f32.mrf.mxu1 }
 0x1d2   :  { %v297_v39 = vadd.f32 %v436_v36, %v296_v37 }
 0x1d3   :  { %v519_v38 = vpop.f32.mrf.mxu1 }
 0x1d4   :  { %v303_v43 = vmax.f32 %v297_v39, 0.0 }
 0x1d5   :  { %v299_v40 = vpop.f32.mrf.mxu1 }
 0x1d6   :  { %v300_v41 = vadd.f32 %v436_v36, %v299_v40 }
 0x1d7   :  { %v520_v42 = vpop.f32.mrf.mxu1 }
 0x1d8   :  { %v304_v44 = vmax.f32 %v300_v41, 0.0 }
 0x1da   :  { %v305_v45 = vpack.c.bf16 %v304_v44, %v303_v43 }
 0x1dc   :  { %538 = vmatmul.mubr.bf16.vlgmr.msra.gmra.mxu0 %v305_v45 }
 0x29c   :  { %v411_v47 = vpop.f32.mrf.mxu0 }
 0x29d   :  { %v412_v48 = vadd.f32 %v445_v46, %v411_v47 }
 0x29e   :  { %v539_v49 = vpop.f32.mrf.mxu0 }
 0x29f   :  { %418 = vst [vmem:[%s748_s7] sm:$0xff] %v412_v48 }
 0x2a0   :  { %v414_v50 = vpop.f32.mrf.mxu0 }
 0x2a1   :  { %v415_v51 = vadd.f32 %v445_v46, %v414_v50 }
 0x2a2   :  { %v540_v52 = vpop.f32.mrf.mxu0 }
 0x2a3   :  { %419 = vst [vmem:[%s748_s7 + $0x8] sm:$0xff] %v415_v51 }
 0x2a4   :  { %424 = vsyncpa [#allocation3], 1 }
 0x2a5   :  { %425 = vsyncpa [#allocation5], 1 }

</bundles_post_ra>
